<compile_context>
chip_gen: v7x
topology: tpu7x:2x2x1
jax: 0.10.0
libtpu: 0.0.40
codegen_flags: <defaults>
</compile_context>

<pallas_src>
import jax
import jax.numpy as jnp
from jax import lax
from jax.experimental import pallas as pl
from jax.experimental.pallas import tpu as pltpu


# ----------------------------------------------------------------------------
# unweighted branch (weight is None), lane-major layout:
#   xt : (n, m)   transposed x
#   yt : (k, m)   transposed y
#   out: (k, 1)   -> wrapper transposes to torch's (1, k)
# ----------------------------------------------------------------------------
def ic_unweighted_kernel(xt_ref, yt_ref, ic_ref):
    xt = xt_ref[...].astype(jnp.float32)                  # (n, m)
    yt = yt_ref[...].astype(jnp.float32)                  # (k, m)
    n, m = xt.shape
    k = yt.shape[0]

    # equal-weight factor: mean over the n weak factors (cheap sublane reduce)
    X = jnp.mean(xt, axis=0, keepdims=True)               # (1, m)
    X_mean = jnp.mean(X, axis=1, keepdims=True)           # (1, 1)
    Xr = X - X_mean                                       # (1, m)

    y_row_mean = jnp.mean(yt, axis=1, keepdims=True)      # (k, 1) per-column means
    yr = yt - y_row_mean                                  # (k, m)
    y_all_mean = jnp.mean(y_row_mean)                     # == torch.mean over all of y
    y_dev = yt - y_all_mean                               # (k, m)

    # Fused reductions: one cross-lane sum over m for all 2k+1 rows.
    stacked = jnp.concatenate([Xr * yr, Xr * Xr, y_dev * y_dev], axis=0)  # (2k+1, m)
    sums = jnp.sum(stacked, axis=1, keepdims=True)        # (2k+1, 1)

    num_raw = sums[:k, :]                                 # (k, 1)  = (xr.T @ yr).T (un-divided)
    ss_x = sums[k, 0]                                     # sum(xr^2)
    ss_y = jnp.sum(sums[k + 1:, :])                       # sum((y - mean(y))^2) over all elems

    # IC = (num_raw/m) / (std_x * std_y * (m-1)/m)
    #    = num_raw * rsqrt(var_x * var_y) / (m-1)        (unbiased stds, torch semantics)
    var_x = ss_x / (m - 1.0)
    var_y = ss_y / (k * m - 1.0)
    scale = lax.rsqrt(var_x * var_y) / (m - 1.0)          # EUP rsqrt, exact enough for f32
    ic_ref[...] = num_raw * scale                          # full (k, 1) block store


# ----------------------------------------------------------------------------
# weighted branch, lane-major layout:
#   xt : (n, m),  yt : (1, m),  wt : (1, m),  out : (1, 1)
#   (weights assumed to sum to 1, matching the torch reference)
# ----------------------------------------------------------------------------
def ic_weighted_kernel(xt_ref, yt_ref, wt_ref, ic_ref):
    xt = xt_ref[...].astype(jnp.float32)                  # (n, m)
    yt = yt_ref[...].astype(jnp.float32)                  # (1, m)
    wt = wt_ref[...].astype(jnp.float32)                  # (1, m)

    X = jnp.mean(xt, axis=0, keepdims=True)               # (1, m) equal-weight factor

    # fused pass 1: weighted means of X and y in a single cross-lane reduce
    means = jnp.sum(jnp.concatenate([wt * X, wt * yt], axis=0),
                    axis=1, keepdims=True)                # (2, 1)
    Xr = X - means[0, 0]                                  # (1, m)
    yr = yt - means[1, 0]                                 # (1, m)

    # fused pass 2: numerator + both weighted variances in one reduce
    wXr = wt * Xr
    stacked = jnp.concatenate([wXr * yr, wXr * Xr, wt * yr * yr], axis=0)  # (3, m)
    sums = jnp.sum(stacked, axis=1, keepdims=True)        # (3, 1)

    # IC = numerator * rsqrt(var_X * var_y); full (1,1) block store
    ic_ref[...] = sums[0:1, :] * lax.rsqrt(sums[1, 0] * sums[2, 0])


# ----------------------------------------------------------------------------
# pallas_call helpers (batched over a leading "problem" axis)
# ----------------------------------------------------------------------------
def _ic_unweighted_call(xt, yt):
    """xt: (B, n, m), yt: (B, k, m) -> (B, k, 1)."""
    B, n, m = xt.shape
    k = yt.shape[1]
    return pl.pallas_call(
        ic_unweighted_kernel,
        out_shape=jax.ShapeDtypeStruct((B, k, 1), jnp.float32),
        grid=(B,),
        in_specs=[
            pl.BlockSpec((None, n, m), lambda b: (b, 0, 0)),
            pl.BlockSpec((None, k, m), lambda b: (b, 0, 0)),
        ],
        out_specs=pl.BlockSpec((None, k, 1), lambda b: (b, 0, 0)),
        compiler_params=pltpu.CompilerParams(
            dimension_semantics=("parallel",)),
    )(xt, yt)


def _ic_weighted_call(xt, yt, wt):
    """xt: (B, n, m), yt/wt: (B, 1, m) -> (B, 1, 1)."""
    B, n, m = xt.shape
    return pl.pallas_call(
        ic_weighted_kernel,
        out_shape=jax.ShapeDtypeStruct((B, 1, 1), jnp.float32),
        grid=(B,),
        in_specs=[
            pl.BlockSpec((None, n, m), lambda b: (b, 0, 0)),
            pl.BlockSpec((None, 1, m), lambda b: (b, 0, 0)),
            pl.BlockSpec((None, 1, m), lambda b: (b, 0, 0)),
        ],
        out_specs=pl.BlockSpec((None, 1, 1), lambda b: (b, 0, 0)),
        compiler_params=pltpu.CompilerParams(
            dimension_semantics=("parallel",)),
    )(xt, yt, wt)


# ----------------------------------------------------------------------------
# public wrappers
# ----------------------------------------------------------------------------
def get_equal_weight_factor_ic(x, y, weight=None):
    """Single-problem JAX/Pallas equivalent of get_equal_weight_factor_IC.forward."""
    x = jnp.asarray(x, jnp.float32)                       # (m, n)
    xt = x.T[None]                                        # (1, n, m) lane-major
    if weight is None:
        y2 = jnp.asarray(y, jnp.float32)
        if y2.ndim == 1:
            y2 = y2[:, None]                              # (m, k)
        yt = y2.T[None]                                   # (1, k, m)
        ic = _ic_unweighted_call(xt, yt)                  # (1, k, 1)
        return ic[0].T                                    # (1, k), like torch matmul result
    else:
        yt = jnp.asarray(y, jnp.float32).reshape(-1)[None, None, :]       # (1, 1, m)
        wt = jnp.asarray(weight, jnp.float32).reshape(-1)[None, None, :]  # (1, 1, m)
        ic = _ic_weighted_call(xt, yt, wt)                # (1, 1, 1)
        return ic[0, 0, 0]                                # scalar, like torch 0-dim result


def get_equal_weight_factor_ic_batched(x, y, weight=None):
    """Batched version: x (B, m, n); y (B, m) or (B, m, k); weight (B, m).

    Amortizes launch overhead over B problems; the batch grid axis is marked
    "parallel" so v7x's two TensorCores split the work.
    Returns (B, k) for the unweighted branch, (B,) for the weighted branch.
    """
    x = jnp.asarray(x, jnp.float32)                       # (B, m, n)
    xt = jnp.swapaxes(x, 1, 2)                            # (B, n, m)
    if weight is None:
        y2 = jnp.asarray(y, jnp.float32)
        if y2.ndim == 2:
            y2 = y2[..., None]                            # (B, m, 1)
        yt = jnp.swapaxes(y2, 1, 2)                       # (B, k, m)
        ic = _ic_unweighted_call(xt, yt)                  # (B, k, 1)
        return ic[:, :, 0]                                # (B, k)
    else:
        yt = jnp.asarray(y, jnp.float32)[:, None, :]      # (B, 1, m)
        wt = jnp.asarray(weight, jnp.float32)[:, None, :] # (B, 1, m)
        ic = _ic_weighted_call(xt, yt, wt)                # (B, 1, 1)
        return ic[:, 0, 0]                                # (B,)


# ----------------------------------------------------------------------------
# pure-JAX references (mirror the torch code exactly)
# ----------------------------------------------------------------------------
def _ref_unweighted(x, y):
    m = x.shape[0]
    f = (m - 1) / m
    xm = x.mean(axis=1).reshape(m, 1)
    xr = xm - xm.mean(axis=0)
    yr = y - y.mean(axis=0)
    num = (xr.T @ yr) / m
    den = jnp.std(xm, ddof=1) * jnp.std(y, ddof=1) * f
    return num / den


def _ref_weighted(x, y, w):
    X = x.mean(axis=1)
    Xm = (X * w).sum()
    ym = (y * w).sum()
    Xr = X - Xm
    yr = y - ym
    num = (w * Xr * yr).sum()
    return num / jnp.sqrt((w * Xr * Xr).sum() * (w * yr * yr).sum())


if __name__ == "__main__":
    key = jax.random.PRNGKey(0)
    kx, ky, kw = jax.random.split(key, 3)

    m, n = 64, 8                                          # m samples, n weak factors
    x = jax.random.normal(kx, (m, n), dtype=jnp.float32)
    y = jax.random.normal(ky, (m, 1), dtype=jnp.float32)
    w = jax.nn.softmax(jax.random.normal(kw, (m,), dtype=jnp.float32))  # sums to 1

    # --- single problem, unweighted branch ---
    ic_unw = get_equal_weight_factor_ic(x, y, weight=None)
    jax.block_until_ready(ic_unw)
    ref_unw = _ref_unweighted(x, y)
    assert ic_unw.shape == (1, 1), ic_unw.shape
    assert jnp.allclose(ic_unw, ref_unw, rtol=1e-4, atol=1e-5), (ic_unw, ref_unw)

    # --- single problem, weighted branch ---
    ic_w = get_equal_weight_factor_ic(x, y[:, 0], weight=w)
    jax.block_until_ready(ic_w)
    ref_w = _ref_weighted(x, y[:, 0], w)
    assert jnp.allclose(ic_w, ref_w, rtol=1e-4, atol=1e-5), (ic_w, ref_w)

    # --- batched problems (one gridded pallas_call, "parallel" batch axis) ---
    B = 4
    kb = jax.random.split(jax.random.PRNGKey(1), 3)
    xb = jax.random.normal(kb[0], (B, m, n), dtype=jnp.float32)
    yb = jax.random.normal(kb[1], (B, m), dtype=jnp.float32)
    wb = jax.nn.softmax(jax.random.normal(kb[2], (B, m), dtype=jnp.float32), axis=-1)

    icb_unw = get_equal_weight_factor_ic_batched(xb, yb)            # (B, 1)
    icb_w = get_equal_weight_factor_ic_batched(xb, yb, weight=wb)   # (B,)
    jax.block_until_ready((icb_unw, icb_w))
    for b in range(B):
        ref_u = _ref_unweighted(xb[b], yb[b].reshape(-1, 1))
        ref_wv = _ref_weighted(xb[b], yb[b], wb[b])
        assert jnp.allclose(icb_unw[b], ref_u[0], rtol=1e-4, atol=1e-5), (b, icb_unw[b], ref_u)
        assert jnp.allclose(icb_w[b], ref_wv, rtol=1e-4, atol=1e-5), (b, icb_w[b], ref_wv)

    print("KERNEL_OK")
</pallas_src>

<mosaic_0001>
module attributes {stable_mosaic.version = 11 : i64} {
  func.func @ic_unweighted_kernel(%arg0: i32, %arg1: memref<1x8x64xf32, #tpu.memory_space<vmem>>, %arg2: memref<1x1x64xf32, #tpu.memory_space<vmem>>, %arg3: memref<1x1x1xf32, #tpu.memory_space<vmem>>) attributes {dimension_semantics = [#tpu.dimension_semantics<parallel>], iteration_bounds = array<i64: 1>, scalar_prefetch = 0 : i64, scratch_operands = 0 : i64, tpu.core_type = #tpu.core_type<tc>, window_params = [{transform_indices = @transform_0, window_bounds = array<i64: 1, 8, 64>}, {transform_indices = @transform_1, window_bounds = array<i64: 1, 1, 64>}, {transform_indices = @transform_2, window_bounds = array<i64: 1, 1, 1>}]} {
    %c0 = arith.constant 0 : index
    %c0_0 = arith.constant 0 : index
    %c0_1 = arith.constant 0 : index
    %0 = vector.load %arg1[%c0, %c0_0, %c0_1] : memref<1x8x64xf32, #tpu.memory_space<vmem>>, vector<1x8x64xf32>
    %1 = vector.shape_cast %0 : vector<1x8x64xf32> to vector<8x64xf32>
    %c0_2 = arith.constant 0 : index
    %c0_3 = arith.constant 0 : index
    %c0_4 = arith.constant 0 : index
    %2 = vector.load %arg2[%c0_2, %c0_3, %c0_4] : memref<1x1x64xf32, #tpu.memory_space<vmem>>, vector<1x1x64xf32>
    %3 = vector.shape_cast %2 : vector<1x1x64xf32> to vector<1x64xf32>
    %cst = arith.constant dense<0.000000e+00> : vector<64xf32>
    %4 = vector.multi_reduction <add>, %1, %cst [0] : vector<8x64xf32> to vector<64xf32>
    %5 = vector.shape_cast %4 : vector<64xf32> to vector<1x64xf32>
    %cst_5 = arith.constant 8.000000e+00 : f32
    %6 = vector.broadcast %cst_5 : f32 to vector<1x64xf32>
    %7 = arith.divf %5, %6 : vector<1x64xf32>
    %cst_6 = arith.constant dense<0.000000e+00> : vector<1xf32>
    %8 = vector.multi_reduction <add>, %7, %cst_6 [1] : vector<1x64xf32> to vector<1xf32>
    %9 = vector.shape_cast %8 : vector<1xf32> to vector<1x1xf32>
    %cst_7 = arith.constant 6.400000e+01 : f32
    %10 = vector.broadcast %cst_7 : f32 to vector<1x1xf32>
    %11 = arith.divf %9, %10 : vector<1x1xf32>
    %12 = vector.broadcast %11 : vector<1x1xf32> to vector<1x64xf32>
    %13 = arith.subf %7, %12 : vector<1x64xf32>
    %cst_8 = arith.constant dense<0.000000e+00> : vector<1xf32>
    %14 = vector.multi_reduction <add>, %3, %cst_8 [1] : vector<1x64xf32> to vector<1xf32>
    %15 = vector.shape_cast %14 : vector<1xf32> to vector<1x1xf32>
    %cst_9 = arith.constant 6.400000e+01 : f32
    %16 = vector.broadcast %cst_9 : f32 to vector<1x1xf32>
    %17 = arith.divf %15, %16 : vector<1x1xf32>
    %18 = vector.broadcast %17 : vector<1x1xf32> to vector<1x64xf32>
    %19 = arith.subf %3, %18 : vector<1x64xf32>
    %20 = vector.shape_cast %17 : vector<1x1xf32> to vector<1x1x1xf32>
    %cst_10 = arith.constant dense<0.000000e+00> : vector<1xf32>
    %21 = vector.multi_reduction <add>, %20, %cst_10 [1, 2] : vector<1x1x1xf32> to vector<1xf32>
    %22 = vector.shape_cast %21 : vector<1xf32> to vector<1x1x1xf32>
    %23 = vector.extract %22[0, 0, 0] : f32 from vector<1x1x1xf32>
    %cst_11 = arith.constant 1.000000e+00 : f32
    %24 = arith.divf %23, %cst_11 : f32
    %25 = vector.broadcast %24 : f32 to vector<1x64xf32>
    %26 = arith.subf %3, %25 : vector<1x64xf32>
    %27 = arith.mulf %13, %19 : vector<1x64xf32>
    %28 = arith.mulf %13, %13 : vector<1x64xf32>
    %29 = arith.mulf %26, %26 : vector<1x64xf32>
    %30 = tpu.concatenate %27, %28, %29 in 0 : vector<1x64xf32>, vector<1x64xf32>, vector<1x64xf32> -> vector<3x64xf32>
    %cst_12 = arith.constant dense<0.000000e+00> : vector<3xf32>
    %31 = vector.multi_reduction <add>, %30, %cst_12 [1] : vector<3x64xf32> to vector<3xf32>
    %32 = vector.shape_cast %31 : vector<3xf32> to vector<3x1xf32>
    %33 = vector.extract_strided_slice %32 {offsets = [0, 0], sizes = [1, 1], strides = [1, 1]} : vector<3x1xf32> to vector<1x1xf32>
    %34 = vector.extract_strided_slice %32 {offsets = [1, 0], sizes = [1, 1], strides = [1, 1]} : vector<3x1xf32> to vector<1x1xf32>
    %35 = vector.extract %34[0, 0] : f32 from vector<1x1xf32>
    %36 = vector.extract_strided_slice %32 {offsets = [2, 0], sizes = [1, 1], strides = [1, 1]} : vector<3x1xf32> to vector<1x1xf32>
    %37 = vector.shape_cast %36 : vector<1x1xf32> to vector<1x1x1xf32>
    %cst_13 = arith.constant dense<0.000000e+00> : vector<1xf32>
    %38 = vector.multi_reduction <add>, %37, %cst_13 [1, 2] : vector<1x1x1xf32> to vector<1xf32>
    %39 = vector.shape_cast %38 : vector<1xf32> to vector<1x1x1xf32>
    %40 = vector.extract %39[0, 0, 0] : f32 from vector<1x1x1xf32>
    %cst_14 = arith.constant 6.300000e+01 : f32
    %41 = arith.divf %35, %cst_14 : f32
    %cst_15 = arith.constant 6.300000e+01 : f32
    %42 = arith.divf %40, %cst_15 : f32
    %43 = arith.mulf %41, %42 : f32
    %44 = math.rsqrt %43 : f32
    %cst_16 = arith.constant 6.300000e+01 : f32
    %45 = arith.divf %44, %cst_16 : f32
    %46 = vector.broadcast %45 : f32 to vector<1x1xf32>
    %47 = arith.mulf %33, %46 : vector<1x1xf32>
    %c0_17 = arith.constant 0 : index
    %c0_18 = arith.constant 0 : index
    %c0_19 = arith.constant 0 : index
    %48 = vector.load %arg3[%c0_17, %c0_18, %c0_19] : memref<1x1x1xf32, #tpu.memory_space<vmem>>, vector<1x1x1xf32>
    %49 = vector.shape_cast %48 : vector<1x1x1xf32> to vector<1x1xf32>
    %50 = vector.shape_cast %47 : vector<1x1xf32> to vector<1x1x1xf32>
    tpu.vector_store %arg3[%c0_17, %c0_18, %c0_19], %50 {strides = array<i32>} : memref<1x1x1xf32, #tpu.memory_space<vmem>>, vector<1x1x1xf32>,
    return
  }
  func.func @transform_0(%arg0: i32) -> (i32, i32, i32) {
    %c0_i32 = arith.constant 0 : i32
    %c0_i32_0 = arith.constant 0 : i32
    %c0_i32_1 = arith.constant 0 : i32
    return %arg0, %c0_i32, %c0_i32_0 : i32, i32, i32
  }
  func.func @transform_1(%arg0: i32) -> (i32, i32, i32) {
    %c0_i32 = arith.constant 0 : i32
    %c0_i32_0 = arith.constant 0 : i32
    %c0_i32_1 = arith.constant 0 : i32
    return %arg0, %c0_i32, %c0_i32_0 : i32, i32, i32
  }
  func.func @transform_2(%arg0: i32) -> (i32, i32, i32) {
    %c0_i32 = arith.constant 0 : i32
    %c0_i32_0 = arith.constant 0 : i32
    %c0_i32_1 = arith.constant 0 : i32
    return %arg0, %c0_i32, %c0_i32_0 : i32, i32, i32
  }
}

</mosaic_0001>

<bundles_post_ra>
// kernel: tpu_custom_call.1
= control target key start
LH: loop header
LB: loop body
LE: loop exit
PB: predicated region body
PF: predicated region fallthrough
CT: control target
= control target key end

     0   :  { %7 = vsyncpa [#allocation3], 0  ;;  %s212_s0 = inlined_call_operand.hbm [shape: f32[1,8,64], index: 0, kind: input, shape index: {}]   ;;  %s213_s1 = inlined_call_operand.vmem [shape: f32[1,1,64], index: 1, kind: input, shape index: {}]   ;;  %s214_s2 = inlined_call_operand.hbm [shape: f32[1,1,1], index: 2, kind: output, shape index: {}]  }
   0x1   :  { %8 = vsyncpa [#allocation4], 0  ;;  %s168_s9 = smov [#allocation2]   ;;  %s120_s13 = scalar_lea.hbm %s212_s0, 128 }
   0x2   :  { %s15_s10 = sshll.u32 %s168_s9, 4  ;;  %p121_p0 = scmp.ne.s32.totalorder %s212_s0, %s120_s13  ;;  %s16_s10 = int_to_ptr.vmem [resolvable:$true] %s15_s10 }
   0x3   :  { %p124_p1 = scmp.lt.u32.totalorder %s120_s13, %s212_s0 }
   0x5   :  { %p126_p2 = pnand %p124_p1, %p121_p0 }
   0x7   :  { %129 = shalt.err (!%p126_p2)
}
   0x8   :  { %s130_s18 = scalar_lea.vmem %s16_s10, 128  ;;  %p135_p4 = scmp.lt.s32.totalorder %s16_s10, %s16_s10 }
   0x9   :  { %p131_p3 = scmp.ne.s32.totalorder %s16_s10, %s130_s18  ;;  %p136_p5 = scmp.lt.s32.totalorder %s130_s18, %s130_s18 }
   0xb   :  { %p137_p6 = por %p136_p5, %p135_p4 }
   0xd   :  { %p138_p7 = pnand %p137_p6, %p131_p3 }
   0xf   :  { %141 = shalt.err (!%p138_p7)
}
  0x10   :  { %18 = dma.hbm_to_vmem [thread:$0]  %s212_s0, 128, %s16_s10, [#allocation3]  }
  0x11   :  { %164 = dma.done.wait [#allocation3], 128  }
  0x12   :  { %165 = vsyncadd [#allocation3], 4294967168  ;;  %vm42_vm0 = vcmask 516096   ;;  %vm26_vm1 = vcmask 523264   ;;  %v25_v0 = vld [vmem:[%s213_s1] sm:$0x1]  ;;  %v56_v15 = vlaneseq }
  0x13   :  { %v24_v1 = vld [vmem:[#allocation2] sm:$0xff]  ;;  %v43_v2 = vsel %vm42_vm0, %v25_v0, 0.0  ;;  %vm61_vm2 = vcmask 1040384   ;;  %vm63_vm3 = vcmask 1041408   ;;  %vm65_vm4 = vcmask 518144   ;;  %s169_s29 = smov [#allocation5]  }
  0x14   :  { %v27_v3 = vsel %vm26_vm1, %v24_v1, 0.0  ;;  %44 = vadd.xlane.f32.xlu0 %v43_v2  ;;  %v57_v17 = vshrl.u32 %v56_v15, 7  ;;  %s99_s30 = sshll.u32 %s169_s29, 4  ;;  %vm91_vm5 = vcmask 0   ;;  %s100_s30 = int_to_ptr.vmem [resolvable:$true] %s99_s30 }
  0x15   :  { %v28_v4 = vrot.slane %v27_v3, 4  ;;  %s142_s3 = scalar_lea.vmem %s100_s30, 16  ;;  %s146_s4 = scalar_lea.vmem %s100_s30, 32 }
  0x16   :  { %v58_v22 = vsub.s32 0, %v57_v17  ;;  %p143_p8 = scmp.ne.s32.totalorder %s100_s30, %s142_s3  ;;  %p147_p9 = scmp.lt.s32.totalorder %s100_s30, %s100_s30 }
  0x17   :  { %v29_v5 = vadd.f32 %v28_v4, %v27_v3  ;;  %p148_p10 = scmp.lt.s32.totalorder %s146_s4, %s142_s3 }
  0x19   :  { %v30_v6 = vrot.slane %v29_v5, 2  ;;  %p149_p11 = por %p148_p10, %p147_p9 }
  0x1b   :  { %v31_v7 = vadd.f32 %v30_v6, %v29_v5  ;;  %p150_p12 = pnand %p149_p11, %p143_p8 }
  0x1d   :  { %v32_v8 = vrot.slane %v31_v7, 1 }
  0x1f   :  { %v33_v9 = vadd.f32 %v32_v8, %v31_v7 }
  0x21   :  { %v35_v10 = vmul.f32 0.125, %v33_v9 }
  0x23   :  { %v36_v11 = vsel %vm26_vm1, %v35_v10, 0.0 }
  0x24   :  { %37 = vadd.xlane.f32.xlu0 %v36_v11 }
  0xa1   :  { %v45_v12 = vpop.xlane.xlu0 %44 }
  0xa2   :  { %v46_v13 = vmul.f32 0.015625, %v45_v12 }
  0xa4   :  { %108 = vpush %v46_v13  ;;  %v47_v19 = vsub.f32 %v25_v0, %v46_v13 }
  0xb1   :  { %v38_v14 = vpop.xlane.xlu0 %37 }
  0xb2   :  { %v40_v16 = vmul.f32 0.015625, %v38_v14 }
  0xb4   :  { %v41_v18 = vsub.f32 %v35_v10, %v40_v16 }
  0xb6   :  { %v52_v23 = vmul.f32 %v47_v19, %v41_v18  ;;  %v53_v24 = vmul.f32 %v41_v18, %v41_v18 }
  0xb8   :  { %v62_v27 = vsel %vm61_vm2, %v52_v23, %v53_v24 }
  0xd5   :  { %s109_s0 = spop %108 }
  0xd6   :  { %v50_v20 = vstv %s109_s0 }
  0xd7   :  { %v51_v21 = vsub.f32 %v25_v0, %v50_v20 }
  0xd9   :  { %v54_v25 = vmul.f32 %v51_v21, %v51_v21 }
  0xdb   :  { %v59_v26 = vrot.slane %v54_v25, %v58_v22 }
  0xdd   :  { %v64_v28 = vsel %vm63_vm3, %v62_v27, %v59_v26 }
  0xde   :  { %v66_v29 = vsel %vm65_vm4, %v64_v28, 0.0 }
  0xdf   :  { %67 = vadd.xlane.f32.xlu1 %v66_v29 }
 0x16c   :  { %v68_v30 = vpop.xlane.xlu1 %67 }
 0x16d   :  { %v69_v31 = vrot.slane %v68_v30, 1  ;;  %v73_v32 = vrot.slane %v68_v30, 2 }
 0x16f   :  { %110 = vpush %v69_v31 }
 0x170   :  { %112 = vpush %v73_v32 }
 0x1a0   :  { %s111_s1 = spop %110 }
 0x1a1   :  { %s78_s23 = smul.f32 0.015873017, %s111_s1  ;;  %s113_s24 = spop %112 }
 0x1a2   :  { %s81_s25 = smul.f32 0.015873017, %s113_s24 }
 0x1a4   :  { %s82_s26 = smul.f32 %s81_s25, %s78_s23 }
 0x1a6   :  { %v83_v33 = vstv %s82_s26 }
 0x1a7   :  { %118 = vrsqrt.f32 %v83_v33 }
 0x1b1   :  { %v119_v34 = vpop.eup %118 }
 0x1b2   :  { %114 = vpush %v119_v34 }
 0x1e3   :  { %s115_s27 = spop %114 }
 0x1e4   :  { %s88_s28 = smul.f32 0.015873017, %s115_s27 }
 0x1e6   :  { %v89_v35 = vstv %s88_s28 }
 0x1e7   :  { %v90_v36 = vmul.f32 %v89_v35, %v68_v30 }
 0x1e9   :  { %92 = vst.msk [vmem:[#allocation5] sm:$0x1] %vm91_vm5, %v90_v36 }
 0x1ea   :  { %153 = shalt.err (!%p150_p12)
}
 0x1eb   :  { %s154_s7 = scalar_lea.hbm %s214_s2, 16 }
 0x1ec   :  { %p155_p13 = scmp.ne.s32.totalorder %s214_s2, %s154_s7  ;;  %p158_p0 = scmp.lt.u32.totalorder %s154_s7, %s214_s2 }
 0x1ee   :  { %p160_p1 = pnand %p158_p0, %p155_p13 }
 0x1f0   :  { %163 = shalt.err (!%p160_p1)
}
 0x1f1   :  { %102 = dma.vmem_to_hbm [thread:$0]  %s100_s30, 16, %s214_s2, [#allocation4]  }
 0x1f2   :  { %166 = dma.done.wait [#allocation4], 16  }
 0x1f3   :  { %167 = vsyncadd [#allocation4], 4294967280 }
 0x1f4   :  { %106 = vsyncpa [#allocation3], 1 }
 0x1f5   :  { %107 = vsyncpa [#allocation4], 1 }

</bundles_post_ra>
